<compile_context>
chip_gen: v7x
topology: tpu7x:2x2x1
jax: 0.10.0
libtpu: 0.0.40
codegen_flags: <defaults>
</compile_context>

<pallas_src>
import functools

import jax
import jax.numpy as jnp
from jax.experimental import pallas as pl
from jax.experimental.pallas import tpu as pltpu

LN_EPS = 1e-5  # torch.nn.LayerNorm default

_HAS_BUFFERED = hasattr(pl, "Buffered")


def _round_up(x, m):
    return ((x + m - 1) // m) * m


def _pick_vmem_limit_bytes():
    """Explicit scoped-VMEM limit: physical capacity minus headroom, capped.

    ~100 MiB on v5e/v6e (128 MiB physical), ~48 MiB on v7x (64 MiB physical).
    """
    cap = None
    try:
        cap = getattr(pltpu.get_tpu_info(), "vmem_capacity_bytes", None)
    except Exception:
        cap = None
    if not cap:
        cap = 64 << 20  # conservative: v7x physical VMEM per TensorCore
    return int(max(32 << 20, min(int(cap) - (16 << 20), 100 << 20)))


def _const_spec(shape, single_buffer):
    """BlockSpec for an operand whose block index never changes over the grid."""
    index_map = lambda *_: (0,) * len(shape)
    if single_buffer and _HAS_BUFFERED:
        # Constant block -> double-buffering only doubles its VMEM footprint.
        return pl.BlockSpec(shape, index_map, pipeline_mode=pl.Buffered(1))
    return pl.BlockSpec(shape, index_map)


def _ln_relu_epilogue(y, p_ref, hidden_size):
    """LayerNorm over the real hidden_size lanes + ReLU, on an f32 tile."""
    hp = y.shape[-1]
    if hp == hidden_size:
        mean = jnp.mean(y, axis=-1, keepdims=True)
        centered = y - mean
        var = jnp.mean(centered * centered, axis=-1, keepdims=True)
    else:
        # Padded lanes of w / b are zero, so y is exactly 0 there: plain row
        # sums over the padded width already equal sums over hidden_size.
        inv_h = jnp.float32(1.0 / hidden_size)
        mean = jnp.sum(y, axis=-1, keepdims=True) * inv_h
        sumsq = jnp.sum(y * y, axis=-1, keepdims=True) * inv_h
        var = jnp.maximum(sumsq - mean * mean, 0.0)
        centered = y - mean
    y_hat = centered * jax.lax.rsqrt(var + LN_EPS)   # rsqrt -> EUP slot (cheap)
    y_ln = y_hat * p_ref[1:2, :] + p_ref[2:3, :]     # padded gamma/beta are 0
    return jnp.maximum(y_ln, 0.0)


def mlp_kernel(x_ref, w_ref, p_ref, o_ref, *, hidden_size):
    # x_ref: (tm, K) activation dtype; w_ref: (K, Hp) activation dtype
    # p_ref: (3, Hp) f32 = [bias; gamma; beta]; o_ref: (tm, Hp)
    y = jnp.dot(x_ref[...], w_ref[...], preferred_element_type=jnp.float32)
    y = y + p_ref[0:1, :]
    o_ref[...] = _ln_relu_epilogue(y, p_ref, hidden_size).astype(o_ref.dtype)


def mlp_kernel_ksplit(x_ref, w_ref, p_ref, o_ref, acc_ref, *, hidden_size):
    # Grid = (M tiles, K tiles); K is last ("arbitrary") with f32 accumulator.
    k = pl.program_id(1)

    @pl.when(k == 0)
    def _():
        acc_ref[...] = jnp.zeros_like(acc_ref)

    acc_ref[...] += jnp.dot(x_ref[...], w_ref[...],
                            preferred_element_type=jnp.float32)

    @pl.when(k == pl.num_programs(1) - 1)
    def _():
        y = acc_ref[...] + p_ref[0:1, :]
        o_ref[...] = _ln_relu_epilogue(y, p_ref, hidden_size).astype(o_ref.dtype)


def mlp_forward(x, w, b, gamma, beta, *, tile_m=512, tile_k=512,
                k_split=None, vmem_limit_bytes=None):
    """x: [B, N, D_in]; w: [D_in, H]; b/gamma/beta: [H]. Returns [B, N, H]."""
    B, N, D_in = x.shape
    H = w.shape[1]
    M = B * N

    # Matmul runs in the activation dtype (bf16 x -> bf16 w), f32 accumulation.
    if w.dtype != x.dtype:
        w = w.astype(x.dtype)

    row_pack = 16 if x.dtype == jnp.bfloat16 else 8
    Hp = _round_up(H, 128)            # lane-dense output / full-lane LN sums

    # M tiling: big tiles clamped to the (row-packed) problem size, then split
    # so the grid has >= 2 steps when possible (v7x megacore sharding).
    m_pack = _round_up(M, row_pack)
    tm = min(_round_up(tile_m, row_pack), m_pack)
    if m_pack > row_pack and tm >= m_pack:
        tm = _round_up((m_pack + 1) // 2, row_pack)
    tm = max(tm, row_pack)
    Mp = _round_up(M, tm)

    x2d = x.reshape(M, D_in)
    if Mp != M:
        x2d = jnp.pad(x2d, ((0, Mp - M), (0, 0)))
    if Hp != H:
        w = jnp.pad(w, ((0, 0), (0, Hp - H)))
        b = jnp.pad(b, (0, Hp - H))
        gamma = jnp.pad(gamma, (0, Hp - H))
        beta = jnp.pad(beta, (0, Hp - H))

    # Bias / gamma / beta packed into a single constant f32 operand.
    params = jnp.stack([b.astype(jnp.float32),
                        gamma.astype(jnp.float32),
                        beta.astype(jnp.float32)], axis=0)      # (3, Hp)

    if vmem_limit_bytes is None:
        vmem_limit_bytes = _pick_vmem_limit_bytes()

    resident_w_bytes = D_in * Hp * jnp.dtype(w.dtype).itemsize
    if k_split is None:
        k_split = resident_w_bytes > (24 << 20)

    if k_split:
        # Pad K to a lane-aligned multiple of the K tile (zeros contribute 0).
        Kp = _round_up(D_in, 128)
        tk = min(_round_up(tile_k, 128), Kp)
        Kp = _round_up(Kp, tk)
        if Kp != D_in:
            x2d = jnp.pad(x2d, ((0, 0), (0, Kp - D_in)))
            w = jnp.pad(w, ((0, Kp - D_in), (0, 0)))

    def _call(single_buffer_consts):
        if not k_split:
            kernel = functools.partial(mlp_kernel, hidden_size=H)
            grid = (Mp // tm,)
            in_specs = [
                pl.BlockSpec((tm, D_in), lambda i: (i, 0)),        # x rows tile
                _const_spec((D_in, Hp), single_buffer_consts),     # resident W
                _const_spec((3, Hp), single_buffer_consts),        # b/gamma/beta
            ]
            out_specs = pl.BlockSpec((tm, Hp), lambda i: (i, 0))
            scratch = []
            dims = ("parallel",)
        else:
            kernel = functools.partial(mlp_kernel_ksplit, hidden_size=H)
            grid = (Mp // tm, Kp // tk)
            in_specs = [
                pl.BlockSpec((tm, tk), lambda i, kk: (i, kk)),     # x K-slab
                pl.BlockSpec((tk, Hp), lambda i, kk: (kk, 0)),     # W K-slab
                _const_spec((3, Hp), single_buffer_consts),        # b/gamma/beta
            ]
            out_specs = pl.BlockSpec((tm, Hp), lambda i, kk: (i, 0))
            scratch = [pltpu.VMEM((tm, Hp), jnp.float32)]
            dims = ("parallel", "arbitrary")

        fn = pl.pallas_call(
            kernel,
            out_shape=jax.ShapeDtypeStruct((Mp, Hp), x.dtype),
            grid_spec=pltpu.PrefetchScalarGridSpec(
                num_scalar_prefetch=0,
                grid=grid,
                in_specs=in_specs,
                out_specs=out_specs,
                scratch_shapes=scratch,
            ),
            compiler_params=pltpu.CompilerParams(
                dimension_semantics=dims,
                vmem_limit_bytes=vmem_limit_bytes,
            ),
        )
        return fn(x2d, w, params)

    try:
        out2d = _call(True)
    except Exception:
        # Fallback if single-buffered constants (pl.Buffered(1)) are rejected
        # by the installed Pallas version; semantics are identical.
        out2d = _call(False)

    return out2d[:M, :H].reshape(B, N, H)


def _reference(x, w, b, gamma, beta):
    y = x.astype(jnp.float32) @ w.astype(jnp.float32) + b
    mu = jnp.mean(y, axis=-1, keepdims=True)
    var = jnp.mean((y - mu) ** 2, axis=-1, keepdims=True)
    y = (y - mu) / jnp.sqrt(var + LN_EPS) * gamma + beta
    return jnp.maximum(y, 0.0)


if __name__ == "__main__":
    key = jax.random.PRNGKey(0)

    def make_params(kp, input_size, hidden_size):
        kw, kb, kg, kbe = jax.random.split(kp, 4)
        bound = 1.0 / (input_size ** 0.5)
        w = jax.random.uniform(kw, (input_size, hidden_size), jnp.float32, -bound, bound)
        b = jax.random.uniform(kb, (hidden_size,), jnp.float32, -bound, bound)
        gamma = jnp.ones((hidden_size,), jnp.float32) + 0.01 * jax.random.normal(kg, (hidden_size,))
        beta = 0.01 * jax.random.normal(kbe, (hidden_size,))
        return w, b, gamma, beta

    # Case 1: module-default shapes (x = [batch, n, input_size], hidden=64), f32.
    batch, n, input_size, hidden_size = 2, 8, 16, 64
    k1, k2, key = jax.random.split(key, 3)
    x = jax.random.normal(k1, (batch, n, input_size), dtype=jnp.float32)
    w, b, gamma, beta = make_params(k2, input_size, hidden_size)
    out = jax.block_until_ready(mlp_forward(x, w, b, gamma, beta))
    ref = _reference(x, w, b, gamma, beta)
    assert out.shape == (batch, n, hidden_size)
    assert jnp.allclose(out, ref, atol=1e-4, rtol=1e-4)

    # Case 2: ragged M (batch*n not a multiple of 8) exercises the tail padding.
    k3, k4, key = jax.random.split(key, 3)
    x2 = jax.random.normal(k3, (3, 5, input_size), dtype=jnp.float32)
    w2, b2, g2, be2 = make_params(k4, input_size, hidden_size)
    out2 = jax.block_until_ready(mlp_forward(x2, w2, b2, g2, be2))
    ref2 = _reference(x2, w2, b2, g2, be2)
    assert out2.shape == (3, 5, hidden_size)
    assert jnp.allclose(out2, ref2, atol=1e-4, rtol=1e-4)

    # Case 3: bf16 activations -- weight is dtype-matched to bf16 in the wrapper.
    k5, k6, key = jax.random.split(key, 3)
    x3 = jax.random.normal(k5, (batch, n, input_size), dtype=jnp.float32).astype(jnp.bfloat16)
    w3, b3, g3, be3 = make_params(k6, input_size, hidden_size)
    w3 = w3.astype(jnp.bfloat16)
    out3 = jax.block_until_ready(mlp_forward(x3, w3, b3, g3, be3))
    ref3 = _reference(x3, w3, b3, g3, be3)
    assert out3.shape == (batch, n, hidden_size)
    assert jnp.allclose(out3.astype(jnp.float32), ref3, atol=2e-2, rtol=2e-2)

    # Case 4: forced K-split path (K grid axis + f32 accumulator) at small scale.
    k7, k8, key = jax.random.split(key, 3)
    din4 = 300
    x4 = jax.random.normal(k7, (batch, n, din4), dtype=jnp.float32)
    w4, b4, g4, be4 = make_params(k8, din4, hidden_size)
    out4 = jax.block_until_ready(
        mlp_forward(x4, w4, b4, g4, be4, k_split=True, tile_k=128))
    ref4 = _reference(x4, w4, b4, g4, be4)
    assert out4.shape == (batch, n, hidden_size)
    assert jnp.allclose(out4, ref4, atol=1e-3, rtol=1e-3)

    print("KERNEL_OK")
</pallas_src>

<mosaic_0001>
module attributes {stable_mosaic.version = 11 : i64} {
  func.func @mlp_kernel(%arg0: i32, %arg1: memref<8x16xf32, #tpu.memory_space<vmem>>, %arg2: memref<16x128xf32, #tpu.memory_space<vmem>>, %arg3: memref<3x128xf32, #tpu.memory_space<vmem>>, %arg4: memref<8x128xf32, #tpu.memory_space<vmem>>) attributes {dimension_semantics = [#tpu.dimension_semantics<parallel>], iteration_bounds = array<i64: 2>, scalar_prefetch = 0 : i64, scratch_operands = 0 : i64, tpu.core_type = #tpu.core_type<tc>, window_params = [{transform_indices = @transform_0, window_bounds = array<i64: 8, 16>}, {pipeline_mode = #tpu.pipeline_mode<synchronous>, transform_indices = @transform_1, window_bounds = array<i64: 16, 128>}, {pipeline_mode = #tpu.pipeline_mode<synchronous>, transform_indices = @transform_2, window_bounds = array<i64: 3, 128>}, {transform_indices = @transform_3, window_bounds = array<i64: 8, 128>}]} {
    %c0 = arith.constant 0 : index
    %c0_0 = arith.constant 0 : index
    %0 = vector.load %arg1[%c0, %c0_0] : memref<8x16xf32, #tpu.memory_space<vmem>>, vector<8x16xf32>
    %c0_1 = arith.constant 0 : index
    %c0_2 = arith.constant 0 : index
    %1 = vector.load %arg2[%c0_1, %c0_2] : memref<16x128xf32, #tpu.memory_space<vmem>>, vector<16x128xf32>
    %cst = arith.constant dense<0.000000e+00> : vector<8x128xf32>
    %2 = tpu.matmul %0, %1, %cst {dimension_numbers = #tpu.dot_dimension_numbers<[1], [0], [0], [1], [0, 0, 1, 1], [], []>} : vector<8x16xf32>, vector<16x128xf32>, vector<8x128xf32> -> vector<8x128xf32>
    %c0_3 = arith.constant 0 : index
    %c0_4 = arith.constant 0 : index
    %3 = vector.load %arg3[%c0_3, %c0_4] : memref<3x128xf32, #tpu.memory_space<vmem>>, vector<1x128xf32>
    %4 = vector.broadcast %3 : vector<1x128xf32> to vector<8x128xf32>
    %5 = arith.addf %2, %4 : vector<8x128xf32>
    %cst_5 = arith.constant dense<0.000000e+00> : vector<8xf32>
    %6 = vector.multi_reduction <add>, %5, %cst_5 [1] : vector<8x128xf32> to vector<8xf32>
    %7 = vector.shape_cast %6 : vector<8xf32> to vector<8x1xf32>
    %cst_6 = arith.constant 1.562500e-02 : f32
    %8 = vector.broadcast %cst_6 : f32 to vector<8x1xf32>
    %9 = arith.mulf %7, %8 : vector<8x1xf32>
    %10 = arith.mulf %5, %5 : vector<8x128xf32>
    %cst_7 = arith.constant dense<0.000000e+00> : vector<8xf32>
    %11 = vector.multi_reduction <add>, %10, %cst_7 [1] : vector<8x128xf32> to vector<8xf32>
    %12 = vector.shape_cast %11 : vector<8xf32> to vector<8x1xf32>
    %cst_8 = arith.constant 1.562500e-02 : f32
    %13 = vector.broadcast %cst_8 : f32 to vector<8x1xf32>
    %14 = arith.mulf %12, %13 : vector<8x1xf32>
    %15 = arith.mulf %9, %9 : vector<8x1xf32>
    %16 = arith.subf %14, %15 : vector<8x1xf32>
    %cst_9 = arith.constant 0.000000e+00 : f32
    %17 = vector.broadcast %cst_9 : f32 to vector<8x1xf32>
    %18 = arith.maximumf %16, %17 : vector<8x1xf32>
    %19 = vector.broadcast %9 : vector<8x1xf32> to vector<8x128xf32>
    %20 = arith.subf %5, %19 : vector<8x128xf32>
    %cst_10 = arith.constant 9.99999974E-6 : f32
    %21 = vector.broadcast %cst_10 : f32 to vector<8x1xf32>
    %22 = arith.addf %18, %21 : vector<8x1xf32>
    %23 = math.rsqrt %22 : vector<8x1xf32>
    %24 = vector.broadcast %23 : vector<8x1xf32> to vector<8x128xf32>
    %25 = arith.mulf %20, %24 : vector<8x128xf32>
    %c1 = arith.constant 1 : index
    %c0_11 = arith.constant 0 : index
    %26 = vector.load %arg3[%c1, %c0_11] : memref<3x128xf32, #tpu.memory_space<vmem>>, vector<1x128xf32>
    %27 = vector.broadcast %26 : vector<1x128xf32> to vector<8x128xf32>
    %28 = arith.mulf %25, %27 : vector<8x128xf32>
    %c2 = arith.constant 2 : index
    %c0_12 = arith.constant 0 : index
    %29 = vector.load %arg3[%c2, %c0_12] : memref<3x128xf32, #tpu.memory_space<vmem>>, vector<1x128xf32>
    %30 = vector.broadcast %29 : vector<1x128xf32> to vector<8x128xf32>
    %31 = arith.addf %28, %30 : vector<8x128xf32>
    %cst_13 = arith.constant 0.000000e+00 : f32
    %32 = vector.broadcast %cst_13 : f32 to vector<8x128xf32>
    %33 = arith.maximumf %31, %32 : vector<8x128xf32>
    %c0_14 = arith.constant 0 : index
    %c0_15 = arith.constant 0 : index
    %34 = vector.load %arg4[%c0_14, %c0_15] : memref<8x128xf32, #tpu.memory_space<vmem>>, vector<8x128xf32>
    tpu.vector_store %arg4[%c0_14, %c0_15], %33 {strides = array<i32>} : memref<8x128xf32, #tpu.memory_space<vmem>>, vector<8x128xf32>,
    return
  }
  func.func @transform_0(%arg0: i32) -> (i32, i32) {
    %c0_i32 = arith.constant 0 : i32
    %c0_i32_0 = arith.constant 0 : i32
    return %arg0, %c0_i32 : i32, i32
  }
  func.func @transform_1(%arg0: i32) -> (i32, i32) {
    %c0_i32 = arith.constant 0 : i32
    %c0_i32_0 = arith.constant 0 : i32
    %c0_i32_1 = arith.constant 0 : i32
    return %c0_i32, %c0_i32_0 : i32, i32
  }
  func.func @transform_2(%arg0: i32) -> (i32, i32) {
    %c0_i32 = arith.constant 0 : i32
    %c0_i32_0 = arith.constant 0 : i32
    %c0_i32_1 = arith.constant 0 : i32
    return %c0_i32, %c0_i32_0 : i32, i32
  }
  func.func @transform_3(%arg0: i32) -> (i32, i32) {
    %c0_i32 = arith.constant 0 : i32
    %c0_i32_0 = arith.constant 0 : i32
    return %arg0, %c0_i32 : i32, i32
  }
}

module attributes {stable_mosaic.version = 11 : i64} {
  func.func @mlp_kernel(%arg0: i32, %arg1: memref<8x16xf32, #tpu.memory_space<vmem>>, %arg2: memref<16x128xf32, #tpu.memory_space<vmem>>, %arg3: memref<3x128xf32, #tpu.memory_space<vmem>>, %arg4: memref<8x128xf32, #tpu.memory_space<vmem>>) attributes {dimension_semantics = [#tpu.dimension_semantics<parallel>], iteration_bounds = array<i64: 2>, scalar_prefetch = 0 : i64, scratch_operands = 0 : i64, tpu.core_type = #tpu.core_type<tc>, window_params = [{transform_indices = @transform_0, window_bounds = array<i64: 8, 16>}, {pipeline_mode = #tpu.pipeline_mode<synchronous>, transform_indices = @transform_1, window_bounds = array<i64: 16, 128>}, {pipeline_mode = #tpu.pipeline_mode<synchronous>, transform_indices = @transform_2, window_bounds = array<i64: 3, 128>}, {transform_indices = @transform_3, window_bounds = array<i64: 8, 128>}]} {
    %c0 = arith.constant 0 : index
    %c0_0 = arith.constant 0 : index
    %0 = vector.load %arg1[%c0, %c0_0] : memref<8x16xf32, #tpu.memory_space<vmem>>, vector<8x16xf32>
    %c0_1 = arith.constant 0 : index
    %c0_2 = arith.constant 0 : index
    %1 = vector.load %arg2[%c0_1, %c0_2] : memref<16x128xf32, #tpu.memory_space<vmem>>, vector<16x128xf32>
    %cst = arith.constant dense<0.000000e+00> : vector<8x128xf32>
    %2 = tpu.matmul %0, %1, %cst {dimension_numbers = #tpu.dot_dimension_numbers<[1], [0], [0], [1], [0, 0, 1, 1], [], []>} : vector<8x16xf32>, vector<16x128xf32>, vector<8x128xf32> -> vector<8x128xf32>
    %c0_3 = arith.constant 0 : index
    %c0_4 = arith.constant 0 : index
    %3 = vector.load %arg3[%c0_3, %c0_4] : memref<3x128xf32, #tpu.memory_space<vmem>>, vector<1x128xf32>
    %4 = vector.broadcast %3 : vector<1x128xf32> to vector<8x128xf32>
    %5 = arith.addf %2, %4 : vector<8x128xf32>
    %cst_5 = arith.constant dense<0.000000e+00> : vector<8xf32>
    %6 = vector.multi_reduction <add>, %5, %cst_5 [1] : vector<8x128xf32> to vector<8xf32>
    %7 = vector.shape_cast %6 : vector<8xf32> to vector<8x1xf32>
    %cst_6 = arith.constant 1.562500e-02 : f32
    %8 = vector.broadcast %cst_6 : f32 to vector<8x1xf32>
    %9 = arith.mulf %7, %8 : vector<8x1xf32>
    %10 = arith.mulf %5, %5 : vector<8x128xf32>
    %cst_7 = arith.constant dense<0.000000e+00> : vector<8xf32>
    %11 = vector.multi_reduction <add>, %10, %cst_7 [1] : vector<8x128xf32> to vector<8xf32>
    %12 = vector.shape_cast %11 : vector<8xf32> to vector<8x1xf32>
    %cst_8 = arith.constant 1.562500e-02 : f32
    %13 = vector.broadcast %cst_8 : f32 to vector<8x1xf32>
    %14 = arith.mulf %12, %13 : vector<8x1xf32>
    %15 = arith.mulf %9, %9 : vector<8x1xf32>
    %16 = arith.subf %14, %15 : vector<8x1xf32>
    %cst_9 = arith.constant 0.000000e+00 : f32
    %17 = vector.broadcast %cst_9 : f32 to vector<8x1xf32>
    %18 = arith.maximumf %16, %17 : vector<8x1xf32>
    %19 = vector.broadcast %9 : vector<8x1xf32> to vector<8x128xf32>
    %20 = arith.subf %5, %19 : vector<8x128xf32>
    %cst_10 = arith.constant 9.99999974E-6 : f32
    %21 = vector.broadcast %cst_10 : f32 to vector<8x1xf32>
    %22 = arith.addf %18, %21 : vector<8x1xf32>
    %23 = math.rsqrt %22 : vector<8x1xf32>
    %24 = vector.broadcast %23 : vector<8x1xf32> to vector<8x128xf32>
    %25 = arith.mulf %20, %24 : vector<8x128xf32>
    %c1 = arith.constant 1 : index
    %c0_11 = arith.constant 0 : index
    %26 = vector.load %arg3[%c1, %c0_11] : memref<3x128xf32, #tpu.memory_space<vmem>>, vector<1x128xf32>
    %27 = vector.broadcast %26 : vector<1x128xf32> to vector<8x128xf32>
    %28 = arith.mulf %25, %27 : vector<8x128xf32>
    %c2 = arith.constant 2 : index
    %c0_12 = arith.constant 0 : index
    %29 = vector.load %arg3[%c2, %c0_12] : memref<3x128xf32, #tpu.memory_space<vmem>>, vector<1x128xf32>
    %30 = vector.broadcast %29 : vector<1x128xf32> to vector<8x128xf32>
    %31 = arith.addf %28, %30 : vector<8x128xf32>
    %cst_13 = arith.constant 0.000000e+00 : f32
    %32 = vector.broadcast %cst_13 : f32 to vector<8x128xf32>
    %33 = arith.maximumf %31, %32 : vector<8x128xf32>
    %c0_14 = arith.constant 0 : index
    %c0_15 = arith.constant 0 : index
    %34 = vector.load %arg4[%c0_14, %c0_15] : memref<8x128xf32, #tpu.memory_space<vmem>>, vector<8x128xf32>
    tpu.vector_store %arg4[%c0_14, %c0_15], %33 {strides = array<i32>} : memref<8x128xf32, #tpu.memory_space<vmem>>, vector<8x128xf32>,
    return
  }
  func.func @transform_0(%arg0: i32) -> (i32, i32) {
    %c0_i32 = arith.constant 0 : i32
    %c0_i32_0 = arith.constant 0 : i32
    return %arg0, %c0_i32 : i32, i32
  }
  func.func @transform_1(%arg0: i32) -> (i32, i32) {
    %c0_i32 = arith.constant 0 : i32
    %c0_i32_0 = arith.constant 0 : i32
    %c0_i32_1 = arith.constant 0 : i32
    return %c0_i32, %c0_i32_0 : i32, i32
  }
  func.func @transform_2(%arg0: i32) -> (i32, i32) {
    %c0_i32 = arith.constant 0 : i32
    %c0_i32_0 = arith.constant 0 : i32
    %c0_i32_1 = arith.constant 0 : i32
    return %c0_i32, %c0_i32_0 : i32, i32
  }
  func.func @transform_3(%arg0: i32) -> (i32, i32) {
    %c0_i32 = arith.constant 0 : i32
    %c0_i32_0 = arith.constant 0 : i32
    return %arg0, %c0_i32 : i32, i32
  }
}

</mosaic_0001>

<bundles_post_ra>
// kernel: tpu_custom_call.1
= control target key start
LH: loop header
LB: loop body
LE: loop exit
PB: predicated region body
PF: predicated region fallthrough
CT: control target
= control target key end

     0   :  { %8 = vsyncpa [#allocation3], 0  ;;  %s867_s0 = inlined_call_operand.hbm [shape: f32[16,16], index: 0, kind: input, shape index: {}]   ;;  %s868_s1 = inlined_call_operand.hbm [shape: f32[16,128], index: 1, kind: input, shape index: {}]   ;;  %s869_s2 = inlined_call_operand.vmem [shape: f32[3,128], index: 2, kind: input, shape index: {}]   ;;  %s870_s3 = inlined_call_operand.hbm [shape: f32[16,128], index: 3, kind: output, shape index: {}]  }
   0x1   :  { %10 = vsyncpa [#allocation3 + $0x1], 0 }
   0x2   :  { %11 = vsyncpa [#allocation6], 0 }
   0x3   :  { %12 = vsyncpa [#allocation4], 0 }
   0x4   :  { %14 = vsyncpa [#allocation4 + $0x1], 0  ;;  %s658_s12 = smov 0   ;;  %s660_s13 = smov 0  }
   0x5   :  { %s662_s14 = smov 0   ;;  %s664_s15 = smov 0  }
   0x6 LB: > { %s679_s16 = sadd.s32 4294967295, %s628_s15   ;;  %s405_s17 = sadd.s32 4294967294, %s628_s15   ;;  %s628_s15 = sphi %s664_s15, %s890_s15   ;;  %s624_s14 = sphi %s662_s14, %s889_s14   ;;  %s620_s13 = sphi %s660_s13, %s888_s13   ;;  %s616_s12 = sphi %s658_s12, %s887_s12  }
   0x7   : > { %p40_p0 = scmp.ne.s32.totalorder %s620_s13, %s616_s12  ;;  %p871_p1 = scmp.eq.s32.totalorder %s679_s16, 0 }
   0x8   : > { %p112_p3 = scmp.eq.s32.totalorder %s405_s17, 1  ;;  %p406_p5 = scmp.ge.s32.totalorder %s628_s15, 1 }
   0x9   : > { %p688_p4 = por %p871_p1, %p40_p0  ;;  %p119_p7 = scmp.lt.s32.totalorder %s628_s15, 3 }
   0xa   : > { %p693_p6 = por %p112_p3, %p40_p0  ;;  %s630_s21 = smov [#allocation5]  }
   0xb   : > { %s874_s18 = scalar_select %p688_p4, 1, 0 }
   0xc   : > { %s875_s19 = scalar_select %p693_p6, 1, 0 }
   0xd   : > { %p698_p8 = pnand %p406_p5, %p119_p7  ;;  %s131_s22 = sshll.u32 %s630_s21, 4  ;;  %s702_s22 = int_to_ptr.vmem [resolvable:$true] %s131_s22 }
   0xe   : > { %s714_s24 = sadd.s32 1, %s628_s15   ;;  %s27_s25 = sadd.s32 1, %s624_s14 }
   0xf   : > { %s876_s20 = scalar_select %p698_p8, 1, 0 }
  0x10   : > { %p444_p9 = pneg %p698_p8  ;;  %s24_s26 = ssub.s32 %s628_s15, %s714_s24 }
  0x11   : > { %s500_s29 = scalar_lea.hbm %s868_s1, 256 }
  0x12   : > { %p709_p11 = pnand %p444_p9, %p871_p1  ;;  %p501_p12 = scmp.ne.s32.totalorder %s868_s1, %s500_s29 }
  0x13   : > { %p507_p5 = scmp.lt.u32.totalorder %s500_s29, %s868_s1 }
  0x14   : > { %p502_p13 = pneg %p709_p11 }
  0x16   : > { %p503_p0 = pnand %p502_p13, %p501_p12 }
  0x18   : > { %p504_p3 = pneg %p503_p0 }
  0x1a   : > { %p509_p7 = pnand %p507_p5, %p504_p3 }
  0x1c   : > { %512 = shalt.err (!%p509_p7)
}
  0x1d   : > { %s513_s7 = scalar_lea.vmem %s702_s22, 256  ;;  %p521_p2 = scmp.lt.s32.totalorder %s702_s22, %s702_s22 }
  0x1e   : > { %p514_p9 = scmp.ne.s32.totalorder %s702_s22, %s513_s7  ;;  %p522_p6 = scmp.lt.s32.totalorder %s513_s7, %s513_s7 }
  0x20   : > { %p516_p10 = pnand %p514_p9, %p502_p13  ;;  %p523_p4 = por %p522_p6, %p521_p2 }
  0x22   : > { %p517_p1 = pneg %p516_p10 }
  0x24   : > { %p524_p8 = pnand %p523_p4, %p517_p1 }
  0x26   : > { %527 = shalt.err (!%p524_p8)
}
  0x27   : > { %s631_s8 = smov 128   ;;  %s632_s9 = smov 8  }
  0x28   : > { %447 = dma.hbm_to_vmem [thread:$0]  (!%p709_p11), %s868_s1, 256, %s702_s22, [#allocation6], %s631_s8, %s631_s8, %s632_s9  }
  0x29   : > { %p25_p2 = scmp.eq.s32.totalorder %s24_s26, 0  ;;  %p34_p1 = scmp.ne.s32.totalorder %s624_s14, %s620_s13 }
  0x2a   : > { %p35_p4 = scmp.eq.s32.totalorder %s628_s15, 0  ;;  %p457_p6 = scmp.lt.s32.totalorder %s628_s15, 2 }
  0x2b   : > { %s745_s17 = scalar_select %p25_p2, %s624_s14, %s27_s25  }
  0x2c   : > { %p36_p8 = por %p35_p4, %p34_p1  ;;  %p878_p10 = scmp.eq.s32.totalorder %s679_s16, 1 }
  0x2d   : > { %s148_s27 = sand.u32 1, %s624_s14   ;;  %s410_s28 = sshll.u32 %s628_s15, 7 }
  0x2e   : > { %p749_p12 = por %p878_p10, %p34_p1  ;;  %s409_s29 = sshll.u32 %s148_s27, 3 }
  0x2f   : > { %s758_s4 = scalar_lea.hbm %s867_s0, %s410_s28  ;;  %s152_s22 = scalar_lea.vmem [#allocation2], %s409_s29 }
  0x30   : > { %s159_s25 = sshll.u32 %s152_s22, 4  ;;  %p760_p11 = pnand %p457_p6, %p36_p8  ;;  %s764_s25 = int_to_ptr.vmem [resolvable:$true] %s159_s25 }
  0x31   : > { %s149_s5 = scalar_lea.sflag [#allocation3], %s148_s27  ;;  %s528_s6 = scalar_lea.hbm %s758_s4, 128 }
  0x32   : > { %p529_p13 = scmp.ne.s32.totalorder %s758_s4, %s528_s6  ;;  %p530_p0 = pneg %p760_p11 }
  0x33   : > { %s533_s9 = scalar_lea.hbm %s867_s0, 256  ;;  %p534_p7 = scmp.lt.u32.totalorder %s758_s4, %s867_s0 }
  0x34   : > { %p531_p3 = pnand %p530_p0, %p529_p13  ;;  %p535_p9 = scmp.lt.u32.totalorder %s533_s9, %s528_s6 }
  0x35   : > { %p537_p1 = scmp.lt.u32.totalorder %s528_s6, %s758_s4 }
  0x36   : > { %p532_p5 = pneg %p531_p3  ;;  %p536_p2 = por %p535_p9, %p534_p7 }
  0x38   : > { %p538_p4 = por %p537_p1, %p536_p2 }
  0x3a   : > { %p539_p6 = pnand %p538_p4, %p532_p5 }
  0x3c   : > { %542 = shalt.err (!%p539_p6)
}
  0x3d   : > { %s543_s27 = scalar_lea.vmem %s764_s25, 128  ;;  %s633_s28 = smov [#allocation2]  }
  0x3e   : > { %p544_p8 = scmp.ne.s32.totalorder %s764_s25, %s543_s27  ;;  %s548_s29 = sshll.u32 %s633_s28, 4  ;;  %s549_s29 = int_to_ptr.vmem [resolvable:$false] %s548_s29 }
  0x3f   : > { %s550_s23 = scalar_lea.vmem %s549_s29, 256  ;;  %p551_p3 = scmp.lt.s32.totalorder %s764_s25, %s549_s29 }
  0x40   : > { %p546_p10 = pnand %p544_p8, %p530_p0  ;;  %p552_p7 = scmp.lt.s32.totalorder %s550_s23, %s543_s27 }
  0x42   : > { %p547_p13 = pneg %p546_p10  ;;  %p553_p9 = por %p552_p7, %p551_p3 }
  0x44   : > { %p554_p2 = pnand %p553_p9, %p547_p13 }
  0x46   : > { %557 = shalt.err (!%p554_p2)
}
  0x47   : > { %451 = dma.hbm_to_vmem [thread:$0]  (!%p760_p11), %s758_s4, 128, %s764_s25, %s149_s5  }
  0x48   : > { %p881_p5 = scmp.ne.s32.totalorder %s876_s20, 0 }
  0x49   : > { %s794_s30 = sand.u32 (!%p881_p5), 1, %s620_s13   ;;  %p882_p0 = scmp.ne.s32.totalorder (!%p881_p5), %s874_s18, 0 }
  0x4a   : > { %168 = sbr.rel (%p881_p5) target bundleno = 492 (0x1ec), region = 32  ;;  %s412_s22 = sshll.u32 (!%p881_p5), %s794_s30, 3 }
  0x4b   : > { %s171_s6 = scalar_lea.sflag (!%p881_p5), [#allocation3], %s794_s30  ;;  %s174_s7 = scalar_lea.vmem (!%p881_p5), [#allocation2], %s412_s22 }
  0x51   : > { %603 = dma.done.wait (%p882_p0), %s171_s6, 128  }
  0x52   : > { %605 = vsyncadd (%p882_p0), %s171_s6, 4294967168  ;;  %p883_p11 = scmp.eq.s32.totalorder %s679_s16, 0 }
  0x54   : > { %607 = dma.done.wait (%p883_p11), [#allocation6], 256   ;;  %p884_p1 = pmov %p883_p11 }
  0x55   : > { %v634_v0 = vmov 0.0|0.0   ;;  %vm635_vm0 = vmmov 0   ;;  %v636_v1 = vmov 0.0   ;;  %v202_v2 = vld [vmem:[#allocation5] sm:$0xff]  ;;  %v203_v3 = vld [vmem:[#allocation5 + $0x8] sm:$0xff]  ;;  %v201_v5 = vld [vmem:[%s174_s7] sm:$0xff] }
  0x56   : > { %609 = vsyncadd (%p884_p1), [#allocation6], 4294967040  ;;  %433 = vmatprep.subr.bf16.mxu0 %v634_v0  ;;  %430 = vmatprep.mubr.msk.f32.mxu0 %vm635_vm0, %v636_v1  ;;  %v434_v4 = vpack.c.bf16 %v203_v3, %v202_v2  ;;  %vm209_vm1 = vcmask 130048   ;;  %v415_v6 = vld [vmem:[%s869_s2] ss:$0 sm:$0xff]  ;;  %s420_s8 = sshll.u32 %s679_s16, 7 }
  0x57   : > { %v417_v21 = vld [vmem:[%s869_s2 + $0x1] ss:$0 sm:$0xff]  ;;  %v418_v23 = vld [vmem:[%s869_s2 + $0x2] ss:$0 sm:$0xff]  ;;  %s200_s9 = scalar_lea.vmem [#allocation7], %s412_s22  ;;  %s823_s28 = scalar_lea.hbm %s870_s3, %s420_s8 }
  0x58   : > { %435 = vmatpush3.bf16.msra.mxu0 %v434_v4  ;;  %s325_s10 = sshll.u32 %s200_s9, 4  ;;  %s312_s29 = scalar_lea.sflag [#allocation4], %s794_s30  ;;  %s825_s10 = int_to_ptr.vmem [resolvable:$true] %s325_s10 }
  0x59   : > { %s558_s23 = scalar_lea.vmem %s825_s10, 128  ;;  %s637_s16 = smov [#allocation7]  }
  0x5a   : > { %p559_p4 = scmp.ne.s32.totalorder %s825_s10, %s558_s23  ;;  %s562_s22 = sshll.u32 %s637_s16, 4  ;;  %s563_s22 = int_to_ptr.vmem [resolvable:$false] %s562_s22 }
  0x5b   : > { %431 = vmatmul.mubr.msk.f32.vlgmr.msra.gmra.mrb[0].mxu0 %vm209_vm1, %v201_v5  ;;  %s564_s6 = scalar_lea.vmem %s563_s22, 256  ;;  %p565_p10 = scmp.lt.s32.totalorder %s825_s10, %s563_s22 }
  0x5c   : > { %p560_p6 = pnand %p559_p4, %p749_p12  ;;  %p566_p13 = scmp.lt.s32.totalorder %s564_s6, %s558_s23 }
  0x5e   : > { %p561_p8 = pneg %p560_p6  ;;  %p567_p3 = por %p566_p13, %p565_p10 }
  0x60   : > { %p568_p7 = pnand %p567_p3, %p561_p8 }
 0x12e   : > { %v279_v7 = vpop.f32.mrb[0].mxu0 }
 0x12f   : > { %v280_v8 = vadd.f32 %v415_v6, %v279_v7  ;;  %v432_v9 = vpop.f32.mrb[1].mxu0 }
 0x131   : > { %283 = vadd.xlane.f32.xlu0 %v280_v8  ;;  %v286_v10 = vmul.f32 %v280_v8, %v280_v8 }
 0x135   : > { %287 = vadd.xlane.f32.xlu0 %v286_v10 }
 0x1be   : > { %v284_v11 = vpop.xlane.xlu0 %283 }
 0x1bf   : > { %v285_v12 = vmul.f32 0.015625, %v284_v11 }
 0x1c1   : > { %v290_v14 = vmul.f32 %v285_v12, %v285_v12  ;;  %v293_v19 = vsub.f32 %v280_v8, %v285_v12 }
 0x1c2   : > { %v288_v13 = vpop.xlane.xlu0 %287 }
 0x1c3   : > { %v289_v15 = vmul.f32 0.015625, %v288_v13 }
 0x1c5   : > { %v291_v16 = vsub.f32 %v289_v15, %v290_v14 }
 0x1c7   : > { %v292_v17 = vmax.f32 %v291_v16, 0.0 }
 0x1c9   : > { %v294_v18 = vadd.f32 1e-05, %v292_v17 }
 0x1cb   : > { %498 = vrsqrt.f32 %v294_v18 }
 0x1d5   : > { %v499_v20 = vpop.eup %498 }
 0x1d6   : > { %v296_v22 = vmul.f32 %v499_v20, %v293_v19 }
 0x1d8   : > { %v302_v24 = vmul.f32 %v417_v21, %v296_v22 }
 0x1da   : > { %v308_v25 = vadd.f32 %v418_v23, %v302_v24 }
 0x1dc   : > { %v309_v26 = vmax.f32 %v308_v25, 0.0 }
 0x1de   : > { %310 = vst [vmem:[%s200_s9] sm:$0xff] %v309_v26 }
 0x1df   : > { %571 = shalt.err (!%p568_p7)
}
 0x1e0   : > { %s572_s30 = scalar_lea.hbm %s823_s28, 128  ;;  %s576_s20 = scalar_lea.hbm %s870_s3, 256 }
 0x1e1   : > { %p573_p9 = scmp.ne.s32.totalorder %s823_s28, %s572_s30  ;;  %p577_p0 = scmp.lt.u32.totalorder %s823_s28, %s870_s3 }
 0x1e2   : > { %p578_p11 = scmp.lt.u32.totalorder %s576_s20, %s572_s30  ;;  %p580_p4 = scmp.lt.u32.totalorder %s572_s30, %s823_s28 }
 0x1e3   : > { %p574_p2 = pnand %p573_p9, %p749_p12 }
 0x1e4   : > { %p579_p1 = por %p578_p11, %p577_p0 }
 0x1e5   : > { %p575_p5 = pneg %p574_p2 }
 0x1e6   : > { %p581_p6 = por %p580_p4, %p579_p1 }
 0x1e8   : > { %p582_p8 = pnand %p581_p6, %p575_p5 }
 0x1ea   : > { %585 = shalt.err (!%p582_p8)
}
 0x1eb   : > { %442 = dma.vmem_to_hbm [thread:$0]  (%p749_p12), %s825_s10, 128, %s823_s28, %s312_s29  }
 0x1ec PF: > { %s337_s26 = sand.u32 1, %s616_s12   ;;  %p885_p10 = scmp.ne.s32.totalorder %s875_s19, 0 }
 0x1ed   : > { %p886_p13 = scmp.ge.s32.totalorder %s628_s15, 2  ;;  %s338_s5 = scalar_lea.sflag [#allocation4], %s337_s26 }
 0x1ef   : > { %p453_p3 = pnand %p886_p13, %p885_p10 }
 0x1f1   : > { %611 = dma.done.wait (!%p453_p3), %s338_s5, 128  }
 0x1f2   : > { %613 = vsyncadd (!%p453_p3), %s338_s5, 4294967168  ;;  %p17_p7 = scmp.ge.s32.totalorder %s714_s24, 4   ;;  %s887_s12 = smov %s620_s13 }
 0x1f3   : > { %s888_s13 = smov %s624_s14  ;;  %s889_s14 = smov %s745_s17 }
 0x1f4   : > { %s890_s15 = smov %s714_s24  ;;  %19 = sbr.rel (!%p17_p7) target bundleno = 6 (0x6), region = 81 }
 0x1fb   :  { %343 = vsyncpa [#allocation3], 1 }
 0x1fc   :  { %345 = vsyncpa [#allocation3 + $0x1], 1 }
 0x1fd   :  { %346 = vsyncpa [#allocation6], 1 }
 0x1fe   :  { %347 = vsyncpa [#allocation4], 1 }
 0x1ff   :  { %349 = vsyncpa [#allocation4 + $0x1], 1 }

// kernel: tpu_custom_call.1
= control target key start
LH: loop header
LB: loop body
LE: loop exit
PB: predicated region body
PF: predicated region fallthrough
CT: control target
= control target key end

     0   :  { %8 = vsyncpa [#allocation3], 0  ;;  %s867_s0 = inlined_call_operand.hbm [shape: f32[16,16], index: 0, kind: input, shape index: {}]   ;;  %s868_s1 = inlined_call_operand.hbm [shape: f32[16,128], index: 1, kind: input, shape index: {}]   ;;  %s869_s2 = inlined_call_operand.vmem [shape: f32[3,128], index: 2, kind: input, shape index: {}]   ;;  %s870_s3 = inlined_call_operand.hbm [shape: f32[16,128], index: 3, kind: output, shape index: {}]  }
   0x1   :  { %10 = vsyncpa [#allocation3 + $0x1], 0 }
   0x2   :  { %11 = vsyncpa [#allocation6], 0 }
   0x3   :  { %12 = vsyncpa [#allocation4], 0 }
   0x4   :  { %14 = vsyncpa [#allocation4 + $0x1], 0  ;;  %s658_s12 = smov 0   ;;  %s660_s13 = smov 0  }
   0x5   :  { %s662_s14 = smov 0   ;;  %s664_s15 = smov 0  }
   0x6 LB: > { %s679_s16 = sadd.s32 4294967295, %s628_s15   ;;  %s405_s17 = sadd.s32 4294967294, %s628_s15   ;;  %s628_s15 = sphi %s664_s15, %s890_s15   ;;  %s624_s14 = sphi %s662_s14, %s889_s14   ;;  %s620_s13 = sphi %s660_s13, %s888_s13   ;;  %s616_s12 = sphi %s658_s12, %s887_s12  }
   0x7   : > { %p40_p0 = scmp.ne.s32.totalorder %s620_s13, %s616_s12  ;;  %p871_p1 = scmp.eq.s32.totalorder %s679_s16, 0 }
   0x8   : > { %p112_p3 = scmp.eq.s32.totalorder %s405_s17, 1  ;;  %p406_p5 = scmp.ge.s32.totalorder %s628_s15, 1 }
   0x9   : > { %p688_p4 = por %p871_p1, %p40_p0  ;;  %p119_p7 = scmp.lt.s32.totalorder %s628_s15, 3 }
   0xa   : > { %p693_p6 = por %p112_p3, %p40_p0  ;;  %s630_s21 = smov [#allocation5]  }
   0xb   : > { %s874_s18 = scalar_select %p688_p4, 1, 0 }
   0xc   : > { %s875_s19 = scalar_select %p693_p6, 1, 0 }
   0xd   : > { %p698_p8 = pnand %p406_p5, %p119_p7  ;;  %s131_s22 = sshll.u32 %s630_s21, 4  ;;  %s702_s22 = int_to_ptr.vmem [resolvable:$true] %s131_s22 }
   0xe   : > { %s714_s24 = sadd.s32 1, %s628_s15   ;;  %s27_s25 = sadd.s32 1, %s624_s14 }
   0xf   : > { %s876_s20 = scalar_select %p698_p8, 1, 0 }
  0x10   : > { %p444_p9 = pneg %p698_p8  ;;  %s24_s26 = ssub.s32 %s628_s15, %s714_s24 }
  0x11   : > { %s500_s29 = scalar_lea.hbm %s868_s1, 256 }
  0x12   : > { %p709_p11 = pnand %p444_p9, %p871_p1  ;;  %p501_p12 = scmp.ne.s32.totalorder %s868_s1, %s500_s29 }
  0x13   : > { %p507_p5 = scmp.lt.u32.totalorder %s500_s29, %s868_s1 }
  0x14   : > { %p502_p13 = pneg %p709_p11 }
  0x16   : > { %p503_p0 = pnand %p502_p13, %p501_p12 }
  0x18   : > { %p504_p3 = pneg %p503_p0 }
  0x1a   : > { %p509_p7 = pnand %p507_p5, %p504_p3 }
  0x1c   : > { %512 = shalt.err (!%p509_p7)
}
  0x1d   : > { %s513_s7 = scalar_lea.vmem %s702_s22, 256  ;;  %p521_p2 = scmp.lt.s32.totalorder %s702_s22, %s702_s22 }
  0x1e   : > { %p514_p9 = scmp.ne.s32.totalorder %s702_s22, %s513_s7  ;;  %p522_p6 = scmp.lt.s32.totalorder %s513_s7, %s513_s7 }
  0x20   : > { %p516_p10 = pnand %p514_p9, %p502_p13  ;;  %p523_p4 = por %p522_p6, %p521_p2 }
  0x22   : > { %p517_p1 = pneg %p516_p10 }
  0x24   : > { %p524_p8 = pnand %p523_p4, %p517_p1 }
  0x26   : > { %527 = shalt.err (!%p524_p8)
}
  0x27   : > { %s631_s8 = smov 128   ;;  %s632_s9 = smov 8  }
  0x28   : > { %447 = dma.hbm_to_vmem [thread:$0]  (!%p709_p11), %s868_s1, 256, %s702_s22, [#allocation6], %s631_s8, %s631_s8, %s632_s9  }
  0x29   : > { %p25_p2 = scmp.eq.s32.totalorder %s24_s26, 0  ;;  %p34_p1 = scmp.ne.s32.totalorder %s624_s14, %s620_s13 }
  0x2a   : > { %p35_p4 = scmp.eq.s32.totalorder %s628_s15, 0  ;;  %p457_p6 = scmp.lt.s32.totalorder %s628_s15, 2 }
  0x2b   : > { %s745_s17 = scalar_select %p25_p2, %s624_s14, %s27_s25  }
  0x2c   : > { %p36_p8 = por %p35_p4, %p34_p1  ;;  %p878_p10 = scmp.eq.s32.totalorder %s679_s16, 1 }
  0x2d   : > { %s148_s27 = sand.u32 1, %s624_s14   ;;  %s410_s28 = sshll.u32 %s628_s15, 7 }
  0x2e   : > { %p749_p12 = por %p878_p10, %p34_p1  ;;  %s409_s29 = sshll.u32 %s148_s27, 3 }
  0x2f   : > { %s758_s4 = scalar_lea.hbm %s867_s0, %s410_s28  ;;  %s152_s22 = scalar_lea.vmem [#allocation2], %s409_s29 }
  0x30   : > { %s159_s25 = sshll.u32 %s152_s22, 4  ;;  %p760_p11 = pnand %p457_p6, %p36_p8  ;;  %s764_s25 = int_to_ptr.vmem [resolvable:$true] %s159_s25 }
  0x31   : > { %s149_s5 = scalar_lea.sflag [#allocation3], %s148_s27  ;;  %s528_s6 = scalar_lea.hbm %s758_s4, 128 }
  0x32   : > { %p529_p13 = scmp.ne.s32.totalorder %s758_s4, %s528_s6  ;;  %p530_p0 = pneg %p760_p11 }
  0x33   : > { %s533_s9 = scalar_lea.hbm %s867_s0, 256  ;;  %p534_p7 = scmp.lt.u32.totalorder %s758_s4, %s867_s0 }
  0x34   : > { %p531_p3 = pnand %p530_p0, %p529_p13  ;;  %p535_p9 = scmp.lt.u32.totalorder %s533_s9, %s528_s6 }
  0x35   : > { %p537_p1 = scmp.lt.u32.totalorder %s528_s6, %s758_s4 }
  0x36   : > { %p532_p5 = pneg %p531_p3  ;;  %p536_p2 = por %p535_p9, %p534_p7 }
  0x38   : > { %p538_p4 = por %p537_p1, %p536_p2 }
  0x3a   : > { %p539_p6 = pnand %p538_p4, %p532_p5 }
  0x3c   : > { %542 = shalt.err (!%p539_p6)
}
  0x3d   : > { %s543_s27 = scalar_lea.vmem %s764_s25, 128  ;;  %s633_s28 = smov [#allocation2]  }
  0x3e   : > { %p544_p8 = scmp.ne.s32.totalorder %s764_s25, %s543_s27  ;;  %s548_s29 = sshll.u32 %s633_s28, 4  ;;  %s549_s29 = int_to_ptr.vmem [resolvable:$false] %s548_s29 }
  0x3f   : > { %s550_s23 = scalar_lea.vmem %s549_s29, 256  ;;  %p551_p3 = scmp.lt.s32.totalorder %s764_s25, %s549_s29 }
  0x40   : > { %p546_p10 = pnand %p544_p8, %p530_p0  ;;  %p552_p7 = scmp.lt.s32.totalorder %s550_s23, %s543_s27 }
  0x42   : > { %p547_p13 = pneg %p546_p10  ;;  %p553_p9 = por %p552_p7, %p551_p3 }
  0x44   : > { %p554_p2 = pnand %p553_p9, %p547_p13 }
  0x46   : > { %557 = shalt.err (!%p554_p2)
}
  0x47   : > { %451 = dma.hbm_to_vmem [thread:$0]  (!%p760_p11), %s758_s4, 128, %s764_s25, %s149_s5  }
  0x48   : > { %p881_p5 = scmp.ne.s32.totalorder %s876_s20, 0 }
  0x49   : > { %s794_s30 = sand.u32 (!%p881_p5), 1, %s620_s13   ;;  %p882_p0 = scmp.ne.s32.totalorder (!%p881_p5), %s874_s18, 0 }
  0x4a   : > { %168 = sbr.rel (%p881_p5) target bundleno = 492 (0x1ec), region = 32  ;;  %s412_s22 = sshll.u32 (!%p881_p5), %s794_s30, 3 }
  0x4b   : > { %s171_s6 = scalar_lea.sflag (!%p881_p5), [#allocation3], %s794_s30  ;;  %s174_s7 = scalar_lea.vmem (!%p881_p5), [#allocation2], %s412_s22 }
  0x51   : > { %603 = dma.done.wait (%p882_p0), %s171_s6, 128  }
  0x52   : > { %605 = vsyncadd (%p882_p0), %s171_s6, 4294967168  ;;  %p883_p11 = scmp.eq.s32.totalorder %s679_s16, 0 }
  0x54   : > { %607 = dma.done.wait (%p883_p11), [#allocation6], 256   ;;  %p884_p1 = pmov %p883_p11 }
  0x55   : > { %v634_v0 = vmov 0.0|0.0   ;;  %vm635_vm0 = vmmov 0   ;;  %v636_v1 = vmov 0.0   ;;  %v202_v2 = vld [vmem:[#allocation5] sm:$0xff]  ;;  %v203_v3 = vld [vmem:[#allocation5 + $0x8] sm:$0xff]  ;;  %v201_v5 = vld [vmem:[%s174_s7] sm:$0xff] }
  0x56   : > { %609 = vsyncadd (%p884_p1), [#allocation6], 4294967040  ;;  %433 = vmatprep.subr.bf16.mxu0 %v634_v0  ;;  %430 = vmatprep.mubr.msk.f32.mxu0 %vm635_vm0, %v636_v1  ;;  %v434_v4 = vpack.c.bf16 %v203_v3, %v202_v2  ;;  %vm209_vm1 = vcmask 130048   ;;  %v415_v6 = vld [vmem:[%s869_s2] ss:$0 sm:$0xff]  ;;  %s420_s8 = sshll.u32 %s679_s16, 7 }
  0x57   : > { %v417_v21 = vld [vmem:[%s869_s2 + $0x1] ss:$0 sm:$0xff]  ;;  %v418_v23 = vld [vmem:[%s869_s2 + $0x2] ss:$0 sm:$0xff]  ;;  %s200_s9 = scalar_lea.vmem [#allocation7], %s412_s22  ;;  %s823_s28 = scalar_lea.hbm %s870_s3, %s420_s8 }
  0x58   : > { %435 = vmatpush3.bf16.msra.mxu0 %v434_v4  ;;  %s325_s10 = sshll.u32 %s200_s9, 4  ;;  %s312_s29 = scalar_lea.sflag [#allocation4], %s794_s30  ;;  %s825_s10 = int_to_ptr.vmem [resolvable:$true] %s325_s10 }
  0x59   : > { %s558_s23 = scalar_lea.vmem %s825_s10, 128  ;;  %s637_s16 = smov [#allocation7]  }
  0x5a   : > { %p559_p4 = scmp.ne.s32.totalorder %s825_s10, %s558_s23  ;;  %s562_s22 = sshll.u32 %s637_s16, 4  ;;  %s563_s22 = int_to_ptr.vmem [resolvable:$false] %s562_s22 }
  0x5b   : > { %431 = vmatmul.mubr.msk.f32.vlgmr.msra.gmra.mrb[0].mxu0 %vm209_vm1, %v201_v5  ;;  %s564_s6 = scalar_lea.vmem %s563_s22, 256  ;;  %p565_p10 = scmp.lt.s32.totalorder %s825_s10, %s563_s22 }
  0x5c   : > { %p560_p6 = pnand %p559_p4, %p749_p12  ;;  %p566_p13 = scmp.lt.s32.totalorder %s564_s6, %s558_s23 }
  0x5e   : > { %p561_p8 = pneg %p560_p6  ;;  %p567_p3 = por %p566_p13, %p565_p10 }
  0x60   : > { %p568_p7 = pnand %p567_p3, %p561_p8 }
 0x12e   : > { %v279_v7 = vpop.f32.mrb[0].mxu0 }
 0x12f   : > { %v280_v8 = vadd.f32 %v415_v6, %v279_v7  ;;  %v432_v9 = vpop.f32.mrb[1].mxu0 }
 0x131   : > { %283 = vadd.xlane.f32.xlu0 %v280_v8  ;;  %v286_v10 = vmul.f32 %v280_v8, %v280_v8 }
 0x135   : > { %287 = vadd.xlane.f32.xlu0 %v286_v10 }
 0x1be   : > { %v284_v11 = vpop.xlane.xlu0 %283 }
 0x1bf   : > { %v285_v12 = vmul.f32 0.015625, %v284_v11 }
 0x1c1   : > { %v290_v14 = vmul.f32 %v285_v12, %v285_v12  ;;  %v293_v19 = vsub.f32 %v280_v8, %v285_v12 }
 0x1c2   : > { %v288_v13 = vpop.xlane.xlu0 %287 }
 0x1c3   : > { %v289_v15 = vmul.f32 0.015625, %v288_v13 }
 0x1c5   : > { %v291_v16 = vsub.f32 %v289_v15, %v290_v14 }
 0x1c7   : > { %v292_v17 = vmax.f32 %v291_v16, 0.0 }
 0x1c9   : > { %v294_v18 = vadd.f32 1e-05, %v292_v17 }
 0x1cb   : > { %498 = vrsqrt.f32 %v294_v18 }
 0x1d5   : > { %v499_v20 = vpop.eup %498 }
 0x1d6   : > { %v296_v22 = vmul.f32 %v499_v20, %v293_v19 }
 0x1d8   : > { %v302_v24 = vmul.f32 %v417_v21, %v296_v22 }
 0x1da   : > { %v308_v25 = vadd.f32 %v418_v23, %v302_v24 }
 0x1dc   : > { %v309_v26 = vmax.f32 %v308_v25, 0.0 }
 0x1de   : > { %310 = vst [vmem:[%s200_s9] sm:$0xff] %v309_v26 }
 0x1df   : > { %571 = shalt.err (!%p568_p7)
}
 0x1e0   : > { %s572_s30 = scalar_lea.hbm %s823_s28, 128  ;;  %s576_s20 = scalar_lea.hbm %s870_s3, 256 }
 0x1e1   : > { %p573_p9 = scmp.ne.s32.totalorder %s823_s28, %s572_s30  ;;  %p577_p0 = scmp.lt.u32.totalorder %s823_s28, %s870_s3 }
 0x1e2   : > { %p578_p11 = scmp.lt.u32.totalorder %s576_s20, %s572_s30  ;;  %p580_p4 = scmp.lt.u32.totalorder %s572_s30, %s823_s28 }
 0x1e3   : > { %p574_p2 = pnand %p573_p9, %p749_p12 }
 0x1e4   : > { %p579_p1 = por %p578_p11, %p577_p0 }
 0x1e5   : > { %p575_p5 = pneg %p574_p2 }
 0x1e6   : > { %p581_p6 = por %p580_p4, %p579_p1 }
 0x1e8   : > { %p582_p8 = pnand %p581_p6, %p575_p5 }
 0x1ea   : > { %585 = shalt.err (!%p582_p8)
}
 0x1eb   : > { %442 = dma.vmem_to_hbm [thread:$0]  (%p749_p12), %s825_s10, 128, %s823_s28, %s312_s29  }
 0x1ec PF: > { %s337_s26 = sand.u32 1, %s616_s12   ;;  %p885_p10 = scmp.ne.s32.totalorder %s875_s19, 0 }
 0x1ed   : > { %p886_p13 = scmp.ge.s32.totalorder %s628_s15, 2  ;;  %s338_s5 = scalar_lea.sflag [#allocation4], %s337_s26 }
 0x1ef   : > { %p453_p3 = pnand %p886_p13, %p885_p10 }
 0x1f1   : > { %611 = dma.done.wait (!%p453_p3), %s338_s5, 128  }
 0x1f2   : > { %613 = vsyncadd (!%p453_p3), %s338_s5, 4294967168  ;;  %p17_p7 = scmp.ge.s32.totalorder %s714_s24, 4   ;;  %s887_s12 = smov %s620_s13 }
 0x1f3   : > { %s888_s13 = smov %s624_s14  ;;  %s889_s14 = smov %s745_s17 }
 0x1f4   : > { %s890_s15 = smov %s714_s24  ;;  %19 = sbr.rel (!%p17_p7) target bundleno = 6 (0x6), region = 81 }
 0x1fb   :  { %343 = vsyncpa [#allocation3], 1 }
 0x1fc   :  { %345 = vsyncpa [#allocation3 + $0x1], 1 }
 0x1fd   :  { %346 = vsyncpa [#allocation6], 1 }
 0x1fe   :  { %347 = vsyncpa [#allocation4], 1 }
 0x1ff   :  { %349 = vsyncpa [#allocation4 + $0x1], 1 }

</bundles_post_ra>
